<compile_context>
chip_gen: v7x
topology: tpu7x:2x2x1
jax: 0.10.0
libtpu: 0.0.40
codegen_flags: <defaults>
</compile_context>

<pallas_src>
import functools

import jax
import jax.numpy as jnp
from jax import lax
from jax.experimental import pallas as pl
from jax.experimental.pallas import tpu as pltpu


# ----------------------------------------------------------------------------
# VMEM budgeting (generation-aware).
# ----------------------------------------------------------------------------
def _vmem_limit_bytes():
    """3/4 of physical VMEM; falls back to a v7x-safe 48 MiB if unknown."""
    try:
        phys = int(pltpu.get_tpu_info().vmem_capacity_bytes)
    except Exception:  # query unavailable (older jax / non-TPU tracing)
        phys = 64 * 1024 * 1024
    return int(phys * 3 // 4)


def _sublane_pack(dtype):
    """Rows per sublane tile: 8 for f32, 16 for bf16, 32 for int8/fp8."""
    return max(8, 32 // jnp.dtype(dtype).itemsize)


def _const_block_spec(shape, index_map):
    """Grid-invariant input: single VMEM buffer (no double buffering)."""
    try:
        return pl.BlockSpec(shape, index_map, pipeline_mode=pl.Buffered(1))
    except TypeError:  # older BlockSpec without pipeline_mode
        return pl.BlockSpec(shape, index_map)


def _choose_stream_tile(n, d, dtype, budget_bytes, row_cap=8192):
    """Largest N tile whose double-buffered fvs block fits `budget_bytes`,
    dtype-aware alignment, preferring a tile that divides N exactly."""
    itemsize = jnp.dtype(dtype).itemsize
    pack = _sublane_pack(dtype)
    if 2 * n * d * itemsize <= budget_bytes or n <= pack:
        return n
    rows = budget_bytes // (2 * d * itemsize)
    rows = max(pack, min(row_cap, (rows // pack) * pack))
    rows = min(rows, n)
    if rows >= n:
        return n
    # Prefer an aligned tile that divides N (removes all masking from the
    # steady state); search down to half the candidate size.
    t = rows
    while t >= max(pack, rows // 2):
        if n % t == 0:
            return t
        t -= pack
    return rows


# ----------------------------------------------------------------------------
# Resident fast path: whole fvs in VMEM, single kernel invocation.
# ----------------------------------------------------------------------------
def _l2agg_resident_kernel(fvs_ref, q0_ref, w_ref, b_ref, out_ref):
    fvs = fvs_ref[...]                                           # (N, D) native dtype

    def attend(q_f32):                                           # q_f32: (1, D) f32
        # e = q . fvs^T without materializing a transpose.
        e = lax.dot_general(q_f32.astype(fvs.dtype), fvs,
                            (((1,), (1,)), ((), ())),
                            preferred_element_type=jnp.float32)  # (1, N)
        m = jnp.max(e, axis=1, keepdims=True)
        p = jnp.exp(e - m)
        denom = jnp.sum(p, axis=1, keepdims=True)
        r = jnp.dot(p.astype(fvs.dtype), fvs,
                    preferred_element_type=jnp.float32)          # (1, D)
        return r * pl.reciprocal(denom, approx=False)

    r0 = attend(q0_ref[...].astype(jnp.float32))
    q1 = jnp.tanh(
        jnp.dot(r0.astype(w_ref.dtype), w_ref[...],
                preferred_element_type=jnp.float32)
        + b_ref[...].astype(jnp.float32))
    r1 = attend(q1)
    out_ref[...] = r1.astype(out_ref.dtype)


def _l2agg_resident(fvs, q0, W, b, vmem_limit):
    N, D = fvs.shape
    return pl.pallas_call(
        _l2agg_resident_kernel,
        out_shape=jax.ShapeDtypeStruct((1, D), fvs.dtype),
        grid=(1,),
        in_specs=[
            pl.BlockSpec((N, D), lambda i: (0, 0)),   # fvs, resident
            pl.BlockSpec((1, D), lambda i: (0, 0)),   # q0
            pl.BlockSpec((D, D), lambda i: (0, 0)),   # W
            pl.BlockSpec((1, D), lambda i: (0, 0)),   # b
        ],
        out_specs=pl.BlockSpec((1, D), lambda i: (0, 0)),
        compiler_params=pltpu.CompilerParams(
            dimension_semantics=("arbitrary",),
            vmem_limit_bytes=vmem_limit),
    )(fvs, q0, W, b)


# ----------------------------------------------------------------------------
# Streaming path: two-phase online softmax over N tiles.
# ----------------------------------------------------------------------------
def _l2agg_stream_kernel(fvs_ref, q0_ref, w_ref, b_ref, out_ref,
                         q_sc, m_sc, l_sc, acc_sc, *, n_total):
    phase = pl.program_id(0)           # 0: attention with q0, 1: attention with q1
    nt = pl.program_id(1)              # tile index along N (reduction axis)
    last_nt = pl.num_programs(1) - 1
    tile_n = fvs_ref.shape[0]          # static block rows

    # ---- per-phase init (first N tile of each phase) -----------------------
    @pl.when(nt == 0)
    def _init_stats():
        m_sc[...] = jnp.full_like(m_sc, -jnp.inf)
        l_sc[...] = jnp.zeros_like(l_sc)
        acc_sc[...] = jnp.zeros_like(acc_sc)

    @pl.when(jnp.logical_and(phase == 0, nt == 0))
    def _init_query():
        q_sc[...] = q0_ref[...].astype(jnp.float32)

    # ---- load this N tile in its native dtype (no whole-array f32 cast) ----
    fvs_tile = fvs_ref[...]                                    # (tile_n, D)
    masked = (n_total % tile_n) != 0                           # static Python bool
    if masked:
        # Row-zeroing guards 0*garbage(NaN) in the OOB part of the final
        # block; it is an identity select on non-final tiles.  The tile
        # chooser prefers divisors of N so this path is usually compiled out.
        rows = nt * tile_n + lax.broadcasted_iota(jnp.int32, (tile_n, 1), 0)
        fvs_tile = jnp.where(rows < n_total, fvs_tile, jnp.zeros_like(fvs_tile))

    # ---- scores e = q . fvs^T without materializing a transpose ------------
    q = q_sc[...]                                              # (1, D) f32
    e = lax.dot_general(q.astype(fvs_tile.dtype), fvs_tile,
                        (((1,), (1,)), ((), ())),
                        preferred_element_type=jnp.float32)    # (1, tile_n)
    if masked:
        cols = nt * tile_n + lax.broadcasted_iota(jnp.int32, (1, tile_n), 1)
        e = jnp.where(cols < n_total, e, -jnp.inf)

    # ---- online softmax + weighted-sum accumulation (stats in f32) ---------
    m_prev = m_sc[...]
    m_new = jnp.maximum(m_prev, jnp.max(e, axis=1, keepdims=True))
    alpha = jnp.exp(m_prev - m_new)
    p = jnp.exp(e - m_new)                                     # (1, tile_n) f32
    l_sc[...] = alpha * l_sc[...] + jnp.sum(p, axis=1, keepdims=True)
    acc_sc[...] = alpha * acc_sc[...] + jnp.dot(
        p.astype(fvs_tile.dtype), fvs_tile, preferred_element_type=jnp.float32)
    m_sc[...] = m_new

    # ---- phase 0 finalize: r0 -> q1 = tanh(r0 @ W + b) ----------------------
    @pl.when(jnp.logical_and(phase == 0, nt == last_nt))
    def _finish_phase0():
        r0 = acc_sc[...] * pl.reciprocal(l_sc[...], approx=False)
        q_sc[...] = jnp.tanh(
            jnp.dot(r0.astype(w_ref.dtype), w_ref[...],
                    preferred_element_type=jnp.float32)
            + b_ref[...].astype(jnp.float32))

    # ---- phase 1 finalize: r1 -> output -------------------------------------
    @pl.when(jnp.logical_and(phase == 1, nt == last_nt))
    def _finish_phase1():
        r1 = acc_sc[...] * pl.reciprocal(l_sc[...], approx=False)
        out_ref[...] = r1.astype(out_ref.dtype)


# ----------------------------------------------------------------------------
# Wrapper.
# ----------------------------------------------------------------------------
def l2_aggregator(fvs, q0, W, b, *, tile_n=None):
    """Pallas implementation of L2Aggregator.forward(fvs)."""
    N, D = fvs.shape
    assert q0.shape == (1, D) and W.shape == (D, D) and b.shape == (1, D)

    itemsize = jnp.dtype(fvs.dtype).itemsize
    pack = _sublane_pack(fvs.dtype)
    vmem_limit = _vmem_limit_bytes()
    fvs_bytes = N * D * itemsize
    param_bytes = (D * D + 2 * D) * jnp.dtype(W.dtype).itemsize

    if tile_n is None:
        # Resident fast path when fvs (+ weights + compiler headroom) fits
        # comfortably inside the chip's VMEM budget.
        if 2 * fvs_bytes + 2 * param_bytes + (2 << 20) <= int(vmem_limit * 0.9):
            return _l2agg_resident(fvs, q0, W, b, vmem_limit)
        # Streaming path: size the double-buffered fvs tile (12-16 MiB class),
        # leaving room for the (single-buffered) params and scratch.
        budget = max(4 << 20,
                     min(16 << 20, vmem_limit - 2 * param_bytes - (4 << 20)))
        tile_n = _choose_stream_tile(N, D, fvs.dtype, budget)
    else:
        tile_n = N if tile_n >= N else max(pack, (tile_n // pack) * pack)

    tile_n = min(tile_n, N)
    if tile_n < N:
        assert tile_n % pack == 0, (
            "partial N tiles must be a multiple of the sublane packing "
            f"({pack} rows for dtype {fvs.dtype})")
    num_nt = pl.cdiv(N, tile_n)

    kernel = functools.partial(_l2agg_stream_kernel, n_total=N)
    return pl.pallas_call(
        kernel,
        out_shape=jax.ShapeDtypeStruct((1, D), fvs.dtype),
        grid_spec=pltpu.PrefetchScalarGridSpec(
            num_scalar_prefetch=0,
            grid=(2, num_nt),                                    # (phase, N tiles)
            in_specs=[
                pl.BlockSpec((tile_n, D), lambda p, n: (n, 0)),  # fvs (tiled, 2-buf)
                _const_block_spec((1, D), lambda p, n: (0, 0)),  # q0 (resident, 1-buf)
                _const_block_spec((D, D), lambda p, n: (0, 0)),  # W  (resident, 1-buf)
                _const_block_spec((1, D), lambda p, n: (0, 0)),  # b  (resident, 1-buf)
            ],
            out_specs=pl.BlockSpec((1, D), lambda p, n: (0, 0)),
            scratch_shapes=[
                pltpu.VMEM((1, D), jnp.float32),   # current query (q0 or q1)
                pltpu.VMEM((1, 1), jnp.float32),   # running max
                pltpu.VMEM((1, 1), jnp.float32),   # running sum
                pltpu.VMEM((1, D), jnp.float32),   # running weighted sum
            ]),
        compiler_params=pltpu.CompilerParams(
            dimension_semantics=("arbitrary", "arbitrary"),
            vmem_limit_bytes=vmem_limit),
    )(fvs, q0, W, b)


def l2_aggregator_ref(fvs, q0, W, b):
    """Pure-JAX reference mirroring the PyTorch forward exactly."""
    e0k = q0 @ fvs.T
    a0k = jax.nn.softmax(e0k, axis=1)
    r0 = a0k @ fvs
    q1 = jnp.tanh(r0 @ W + b)
    e1k = q1 @ fvs.T
    a1k = jax.nn.softmax(e1k, axis=1)
    return a1k @ fvs


if __name__ == "__main__":
    key = jax.random.PRNGKey(0)
    k_fvs, k_w, k_q, k_b, k_fvs2 = jax.random.split(key, 5)

    # --- small test at module-like sizes (N=8 feature vectors, fvdim=32) ----
    N, fvdim = 8, 32
    fvs = jax.random.normal(k_fvs, (N, fvdim), dtype=jnp.float32)
    q0 = 0.1 * jax.random.normal(k_q, (1, fvdim), dtype=jnp.float32)
    W = jax.random.normal(k_w, (fvdim, fvdim), dtype=jnp.float32)
    b = 0.1 * jax.random.normal(k_b, (1, fvdim), dtype=jnp.float32)

    ref = l2_aggregator_ref(fvs, q0, W, b)
    out = jax.block_until_ready(l2_aggregator(fvs, q0, W, b))       # resident path
    assert out.shape == (1, fvdim)
    assert jnp.allclose(out, ref, atol=1e-5, rtol=1e-5), (out, ref)

    out_s = jax.block_until_ready(l2_aggregator(fvs, q0, W, b, tile_n=8))  # streaming
    assert jnp.allclose(out_s, ref, atol=1e-5, rtol=1e-5), (out_s, ref)

    # --- larger test: resident (auto) and forced multi-tile streaming with a
    # --- masked final tile (1000 % 256 != 0) exercising the online softmax --
    N2, D2 = 1000, 128
    fvs2 = jax.random.normal(k_fvs2, (N2, D2), dtype=jnp.float32)
    q0b = 0.1 * jax.random.normal(k_q, (1, D2), dtype=jnp.float32)
    Wb = 0.2 * jax.random.normal(k_w, (D2, D2), dtype=jnp.float32)
    bb = 0.1 * jax.random.normal(k_b, (1, D2), dtype=jnp.float32)
    ref2 = l2_aggregator_ref(fvs2, q0b, Wb, bb)

    out2a = jax.block_until_ready(l2_aggregator(fvs2, q0b, Wb, bb))
    assert jnp.allclose(out2a, ref2, atol=1e-4, rtol=1e-4), (out2a, ref2)

    out2b = jax.block_until_ready(l2_aggregator(fvs2, q0b, Wb, bb, tile_n=256))
    assert jnp.allclose(out2b, ref2, atol=1e-4, rtol=1e-4), (out2b, ref2)

    print("KERNEL_OK")
</pallas_src>

<mosaic_0001>
module attributes {stable_mosaic.version = 11 : i64} {
  func.func @_l2agg_resident_kernel(%arg0: i32, %arg1: memref<8x32xf32, #tpu.memory_space<vmem>>, %arg2: memref<1x32xf32, #tpu.memory_space<vmem>>, %arg3: memref<32x32xf32, #tpu.memory_space<vmem>>, %arg4: memref<1x32xf32, #tpu.memory_space<vmem>>, %arg5: memref<1x32xf32, #tpu.memory_space<vmem>>) attributes {dimension_semantics = [#tpu.dimension_semantics<arbitrary>], iteration_bounds = array<i64: 1>, scalar_prefetch = 0 : i64, scratch_operands = 0 : i64, tpu.core_type = #tpu.core_type<tc>, window_params = [{pipeline_mode = #tpu.pipeline_mode<synchronous>, transform_indices = @transform_0, window_bounds = array<i64: 8, 32>}, {pipeline_mode = #tpu.pipeline_mode<synchronous>, transform_indices = @transform_1, window_bounds = array<i64: 1, 32>}, {pipeline_mode = #tpu.pipeline_mode<synchronous>, transform_indices = @transform_2, window_bounds = array<i64: 32, 32>}, {pipeline_mode = #tpu.pipeline_mode<synchronous>, transform_indices = @transform_3, window_bounds = array<i64: 1, 32>}, {pipeline_mode = #tpu.pipeline_mode<synchronous>, transform_indices = @transform_4, window_bounds = array<i64: 1, 32>}]} {
    %c0 = arith.constant 0 : index
    %c0_0 = arith.constant 0 : index
    %0 = vector.load %arg1[%c0, %c0_0] : memref<8x32xf32, #tpu.memory_space<vmem>>, vector<8x32xf32>
    %c0_1 = arith.constant 0 : index
    %c0_2 = arith.constant 0 : index
    %1 = vector.load %arg2[%c0_1, %c0_2] : memref<1x32xf32, #tpu.memory_space<vmem>>, vector<1x32xf32>
    %cst = arith.constant dense<0.000000e+00> : vector<1x8xf32>
    %2 = tpu.matmul %1, %0, %cst {dimension_numbers = #tpu.dot_dimension_numbers<[1], [1], [0], [0], [0, 0, 1, 0], [], []>} : vector<1x32xf32>, vector<8x32xf32>, vector<1x8xf32> -> vector<1x8xf32>
    %cst_3 = arith.constant dense<0xFF800000> : vector<1xf32>
    %3 = vector.multi_reduction <maximumf>, %2, %cst_3 [1] : vector<1x8xf32> to vector<1xf32>
    %4 = vector.shape_cast %3 : vector<1xf32> to vector<1x1xf32>
    %5 = vector.broadcast %4 : vector<1x1xf32> to vector<1x8xf32>
    %6 = arith.subf %2, %5 : vector<1x8xf32>
    %7 = math.exp %6 : vector<1x8xf32>
    %cst_4 = arith.constant dense<0.000000e+00> : vector<1xf32>
    %8 = vector.multi_reduction <add>, %7, %cst_4 [1] : vector<1x8xf32> to vector<1xf32>
    %9 = vector.shape_cast %8 : vector<1xf32> to vector<1x1xf32>
    %cst_5 = arith.constant dense<0.000000e+00> : vector<1x32xf32>
    %10 = tpu.matmul %7, %0, %cst_5 {dimension_numbers = #tpu.dot_dimension_numbers<[1], [0], [0], [1], [0, 0, 1, 1], [], []>} : vector<1x8xf32>, vector<8x32xf32>, vector<1x32xf32> -> vector<1x32xf32>
    %11 = tpu.reciprocal %9 : vector<1x1xf32> -> vector<1x1xf32>
    %12 = vector.broadcast %11 : vector<1x1xf32> to vector<1x32xf32>
    %13 = arith.mulf %10, %12 : vector<1x32xf32>
    %c0_6 = arith.constant 0 : index
    %c0_7 = arith.constant 0 : index
    %14 = vector.load %arg3[%c0_6, %c0_7] : memref<32x32xf32, #tpu.memory_space<vmem>>, vector<32x32xf32>
    %cst_8 = arith.constant dense<0.000000e+00> : vector<1x32xf32>
    %15 = tpu.matmul %13, %14, %cst_8 {dimension_numbers = #tpu.dot_dimension_numbers<[1], [0], [0], [1], [0, 0, 1, 1], [], []>} : vector<1x32xf32>, vector<32x32xf32>, vector<1x32xf32> -> vector<1x32xf32>
    %c0_9 = arith.constant 0 : index
    %c0_10 = arith.constant 0 : index
    %16 = vector.load %arg4[%c0_9, %c0_10] : memref<1x32xf32, #tpu.memory_space<vmem>>, vector<1x32xf32>
    %17 = arith.addf %15, %16 : vector<1x32xf32>
    %18 = math.tanh %17 : vector<1x32xf32>
    %cst_11 = arith.constant dense<0.000000e+00> : vector<1x8xf32>
    %19 = tpu.matmul %18, %0, %cst_11 {dimension_numbers = #tpu.dot_dimension_numbers<[1], [1], [0], [0], [0, 0, 1, 0], [], []>} : vector<1x32xf32>, vector<8x32xf32>, vector<1x8xf32> -> vector<1x8xf32>
    %cst_12 = arith.constant dense<0xFF800000> : vector<1xf32>
    %20 = vector.multi_reduction <maximumf>, %19, %cst_12 [1] : vector<1x8xf32> to vector<1xf32>
    %21 = vector.shape_cast %20 : vector<1xf32> to vector<1x1xf32>
    %22 = vector.broadcast %21 : vector<1x1xf32> to vector<1x8xf32>
    %23 = arith.subf %19, %22 : vector<1x8xf32>
    %24 = math.exp %23 : vector<1x8xf32>
    %cst_13 = arith.constant dense<0.000000e+00> : vector<1xf32>
    %25 = vector.multi_reduction <add>, %24, %cst_13 [1] : vector<1x8xf32> to vector<1xf32>
    %26 = vector.shape_cast %25 : vector<1xf32> to vector<1x1xf32>
    %cst_14 = arith.constant dense<0.000000e+00> : vector<1x32xf32>
    %27 = tpu.matmul %24, %0, %cst_14 {dimension_numbers = #tpu.dot_dimension_numbers<[1], [0], [0], [1], [0, 0, 1, 1], [], []>} : vector<1x8xf32>, vector<8x32xf32>, vector<1x32xf32> -> vector<1x32xf32>
    %28 = tpu.reciprocal %26 : vector<1x1xf32> -> vector<1x1xf32>
    %29 = vector.broadcast %28 : vector<1x1xf32> to vector<1x32xf32>
    %30 = arith.mulf %27, %29 : vector<1x32xf32>
    %c0_15 = arith.constant 0 : index
    %c0_16 = arith.constant 0 : index
    %31 = vector.load %arg5[%c0_15, %c0_16] : memref<1x32xf32, #tpu.memory_space<vmem>>, vector<1x32xf32>
    tpu.vector_store %arg5[%c0_15, %c0_16], %30 {strides = array<i32>} : memref<1x32xf32, #tpu.memory_space<vmem>>, vector<1x32xf32>,
    return
  }
  func.func @transform_0(%arg0: i32) -> (i32, i32) {
    %c0_i32 = arith.constant 0 : i32
    %c0_i32_0 = arith.constant 0 : i32
    %c0_i32_1 = arith.constant 0 : i32
    return %c0_i32, %c0_i32_0 : i32, i32
  }
  func.func @transform_1(%arg0: i32) -> (i32, i32) {
    %c0_i32 = arith.constant 0 : i32
    %c0_i32_0 = arith.constant 0 : i32
    %c0_i32_1 = arith.constant 0 : i32
    return %c0_i32, %c0_i32_0 : i32, i32
  }
  func.func @transform_2(%arg0: i32) -> (i32, i32) {
    %c0_i32 = arith.constant 0 : i32
    %c0_i32_0 = arith.constant 0 : i32
    %c0_i32_1 = arith.constant 0 : i32
    return %c0_i32, %c0_i32_0 : i32, i32
  }
  func.func @transform_3(%arg0: i32) -> (i32, i32) {
    %c0_i32 = arith.constant 0 : i32
    %c0_i32_0 = arith.constant 0 : i32
    %c0_i32_1 = arith.constant 0 : i32
    return %c0_i32, %c0_i32_0 : i32, i32
  }
  func.func @transform_4(%arg0: i32) -> (i32, i32) {
    %c0_i32 = arith.constant 0 : i32
    %c0_i32_0 = arith.constant 0 : i32
    %c0_i32_1 = arith.constant 0 : i32
    return %c0_i32, %c0_i32_0 : i32, i32
  }
}

</mosaic_0001>

<bundles_post_ra>
// kernel: tpu_custom_call.1
= control target key start
LH: loop header
LB: loop body
LE: loop exit
PB: predicated region body
PF: predicated region fallthrough
CT: control target
= control target key end

     0   :  { %9 = vsyncpa [#allocation3], 0  ;;  %s708_s0 = inlined_call_operand.hbm [shape: f32[8,32], index: 0, kind: input, shape index: {}]   ;;  %s709_s1 = inlined_call_operand.vmem [shape: f32[1,32], index: 1, kind: input, shape index: {}]   ;;  %s710_s2 = inlined_call_operand.hbm [shape: f32[32,32], index: 2, kind: input, shape index: {}]   ;;  %s711_s3 = inlined_call_operand.vmem [shape: f32[1,32], index: 3, kind: input, shape index: {}]   ;;  %s712_s4 = inlined_call_operand.hbm [shape: f32[1,32], index: 4, kind: output, shape index: {}]  }
   0x1   :  { %10 = vsyncpa [#allocation6], 0 }
   0x2   :  { %11 = vsyncpa [#allocation4], 0  ;;  %s610_s15 = smov [#allocation2]   ;;  %s611_s17 = smov [#allocation5]  }
   0x3   :  { %s18_s16 = sshll.u32 %s610_s15, 4  ;;  %s29_s18 = sshll.u32 %s611_s17, 4  ;;  %s19_s16 = int_to_ptr.vmem [resolvable:$true] %s18_s16  ;;  %s643_s18 = int_to_ptr.vmem [resolvable:$true] %s29_s18 }
   0x4   :  { %s538_s21 = scalar_lea.hbm %s708_s0, 128 }
   0x5   :  { %p539_p0 = scmp.ne.s32.totalorder %s708_s0, %s538_s21  ;;  %p542_p1 = scmp.lt.u32.totalorder %s538_s21, %s708_s0 }
   0x7   :  { %p544_p2 = pnand %p542_p1, %p539_p0 }
   0x9   :  { %547 = shalt.err (!%p544_p2)
}
   0xa   :  { %s548_s26 = scalar_lea.vmem %s19_s16, 128  ;;  %p553_p4 = scmp.lt.s32.totalorder %s19_s16, %s19_s16 }
   0xb   :  { %p549_p3 = scmp.ne.s32.totalorder %s19_s16, %s548_s26  ;;  %p554_p5 = scmp.lt.s32.totalorder %s548_s26, %s548_s26 }
   0xd   :  { %p555_p6 = por %p554_p5, %p553_p4 }
   0xf   :  { %p556_p7 = pnand %p555_p6, %p549_p3 }
  0x11   :  { %559 = shalt.err (!%p556_p7)
}
  0x12   :  { %21 = dma.hbm_to_vmem [thread:$0]  %s708_s0, 128, %s19_s16, [#allocation3]  }
  0x13   :  { %s560_s5 = scalar_lea.hbm %s710_s2, 512 }
  0x14   :  { %p561_p8 = scmp.ne.s32.totalorder %s710_s2, %s560_s5  ;;  %p564_p9 = scmp.lt.u32.totalorder %s560_s5, %s710_s2 }
  0x16   :  { %p566_p10 = pnand %p564_p9, %p561_p8 }
  0x18   :  { %569 = shalt.err (!%p566_p10)
}
  0x19   :  { %s570_s10 = scalar_lea.vmem %s643_s18, 512  ;;  %p575_p12 = scmp.lt.s32.totalorder %s643_s18, %s643_s18 }
  0x1a   :  { %p571_p11 = scmp.ne.s32.totalorder %s643_s18, %s570_s10  ;;  %p576_p13 = scmp.lt.s32.totalorder %s570_s10, %s570_s10 }
  0x1c   :  { %p577_p0 = por %p576_p13, %p575_p12 }
  0x1e   :  { %p578_p1 = pnand %p577_p0, %p571_p11 }
  0x20   :  { %581 = shalt.err (!%p578_p1)
}
  0x21   :  { %s612_s0 = smov 128   ;;  %s613_s11 = smov 8  }
  0x22   :  { %35 = dma.hbm_to_vmem [thread:$0]  %s710_s2, 512, %s643_s18, [#allocation6], %s612_s0, %s612_s0, %s613_s11  }
  0x23   :  { %604 = dma.done.wait [#allocation3], 128  }
  0x24   :  { %605 = vsyncadd [#allocation3], 4294967168 }
  0x25   :  { %606 = dma.done.wait [#allocation6], 512  }
  0x26   :  { %607 = vsyncadd [#allocation6], 4294966784  ;;  %v614_v0 = vmov 0.0   ;;  %vm615_vm0 = vmmov 0   ;;  %vm46_vm1 = vcmask 261120   ;;  %v44_v1 = vld [vmem:[#allocation2] sm:$0xff] }
  0x27   :  { %483 = vmatprep.subr.mxu0 %v614_v0  ;;  %485 = vmatprep.mubr.msk.f32.mxu0 %vm615_vm0, %v614_v0  ;;  %v45_v2 = vld [vmem:[%s709_s1] sm:$0x1]  ;;  %vm123_vm2 = vcmask 57344   ;;  %vm133_vm3 = vcmask 64512   ;;  %v209_v11 = vld [vmem:[#allocation5] sm:$0xff]  ;;  %v210_v12 = vld [vmem:[#allocation5 + $0x8] sm:$0xff] }
  0x28   :  { %488 = vmatprep.subr.mxu1 %v614_v0  ;;  %490 = vmatprep.mubr.msk.f32.mxu1 %vm615_vm0, %v614_v0  ;;  %v616_v13 = vmov 0.0|0.0   ;;  %v515_v14 = vpack.c.bf16 %v210_v12, %v209_v11  ;;  %v211_v15 = vld [vmem:[#allocation5 + $0x10] sm:$0xff]  ;;  %v212_v16 = vld [vmem:[#allocation5 + $0x18] sm:$0xff]  ;;  %vm445_vm4 = vcmask 253952  }
  0x29   :  { %484 = vmatpush3.xpose.msk.msra.mxu0 %vm46_vm1, %v44_v1  ;;  %489 = vmatpush3.msra.mxu1 %v44_v1  ;;  %v518_v17 = vpack.c.bf16 %v212_v16, %v211_v15  ;;  %v213_v23 = vld [vmem:[%s711_s3] sm:$0x1]  ;;  %s617_s3 = smov [#allocation7]  }
  0x2a   :  { %504 = vmatprep.subr.mxu0 %v614_v0  ;;  %514 = vmatprep.subr.bf16.mxu1 %v616_v13  ;;  %s453_s16 = sshll.u32 %s617_s3, 4  ;;  %s454_s16 = int_to_ptr.vmem [resolvable:$true] %s453_s16 }
  0x2b   :  { %s582_s17 = scalar_lea.vmem %s454_s16, 16  ;;  %s586_s18 = scalar_lea.vmem %s454_s16, 32 }
  0x2c   :  { %486 = vmatmul.mubr.msk.f32.vlgmr.msra.gmra.mrb[0].mxu0 %vm46_vm1, %v45_v2  ;;  %p583_p2 = scmp.ne.s32.totalorder %s454_s16, %s582_s17  ;;  %p587_p3 = scmp.lt.s32.totalorder %s454_s16, %s454_s16 }
  0x2d   :  { %505 = vmatpush3.xpose.msk.msra.mxu0 %vm46_vm1, %v44_v1  ;;  %506 = vmatprep.mubr.msk.f32.mxu0 %vm615_vm0, %v614_v0  ;;  %p588_p4 = scmp.lt.s32.totalorder %s586_s18, %s582_s17 }
  0x2e   :  { %509 = vmatprep.subr.mxu0 %v614_v0 }
  0x2f   :  { %p589_p5 = por %p588_p4, %p587_p3 }
  0x31   :  { %p590_p6 = pnand %p589_p5, %p583_p2 }
  0xff   :  { %v119_v3 = vpop.f32.mrb[0].mxu0 }
 0x100   :  { %v487_v4 = vpop.f32.mrb[1].mxu0  ;;  %v124_v5 = vsel %vm123_vm2, %v119_v3, -inf }
 0x101   :  { %125 = vmax.xlane.f32.xlu0 %v124_v5 }
 0x18e   :  { %v126_v6 = vpop.xlane.xlu0 %125 }
 0x18f   :  { %v127_v7 = vsub.f32 %v119_v3, %v126_v6 }
 0x191   :  { %v128_v8 = vmul.f32 1.442695, %v127_v7 }
 0x193   :  { %528 = vpow2.f32 %v128_v8 }
 0x19d   :  { %v529_v9 = vpop.eup %528 }
 0x19e   :  { %491 = vmatmul.mubr.msk.f32.vlgmr.msra.gmra.mrb[0].mxu1 %vm133_vm3, %v529_v9  ;;  %v130_v10 = vsel %vm123_vm2, %v529_v9, 0.0 }
 0x19f   :  { %131 = vadd.xlane.f32.xlu0 %v130_v10  ;;  %501 = vmatprep.mubr.msk.f32.mxu1 %vm615_vm0, %v614_v0 }
 0x1a0   :  { %516 = vmatpush3.bf16.msra.mxu1 %v515_v14 }
 0x1a1   :  { %517 = vmatprep.subr.bf16.mxu1 %v616_v13 }
 0x1a4   :  { %519 = vmatpush3.bf16.msra.mxu1 %v518_v17 }
 0x22c   :  { %v132_v18 = vpop.xlane.xlu0 %131 }
 0x22d   :  { %530 = vrcp.f32 %v132_v18 }
 0x237   :  { %v531_v19 = vpop.eup %530 }
 0x271   :  { %v203_v20 = vpop.f32.mrb[0].mxu1 }
 0x272   :  { %v208_v21 = vmul.f32 %v531_v19, %v203_v20  ;;  %v492_v22 = vpop.f32.mrb[1].mxu1 }
 0x274   :  { %502 = vmatmul.mubr.msk.f32.vlgmr.msra.gmra.mrb[2].mxu1 %vm46_vm1, %v208_v21 }
 0x347   :  { %v283_v24 = vpop.f32.mrb[2].mxu1 }
 0x348   :  { %v284_v25 = vadd.f32 %v283_v24, %v213_v23  ;;  %v503_v26 = vpop.f32.mrb[3].mxu1 }
 0x34a   :  { %532 = vtanh.f32 %v284_v25 }
 0x354   :  { %v533_v27 = vpop.eup %532 }
 0x355   :  { %507 = vmatmul.mubr.msk.f32.vlgmr.msra.gmra.mrb[2].mxu0 %vm46_vm1, %v533_v27 }
 0x356   :  { %510 = vmatpush3.msra.mxu0 %v44_v1  ;;  %511 = vmatprep.mubr.msk.f32.mxu0 %vm615_vm0, %v614_v0 }
 0x428   :  { %v357_v28 = vpop.f32.mrb[2].mxu0 }
 0x429   :  { %v508_v29 = vpop.f32.mrb[3].mxu0  ;;  %v361_v30 = vsel %vm123_vm2, %v357_v28, -inf }
 0x42a   :  { %362 = vmax.xlane.f32.xlu1 %v361_v30 }
 0x4b7   :  { %v363_v31 = vpop.xlane.xlu1 %362 }
 0x4b8   :  { %v364_v32 = vsub.f32 %v357_v28, %v363_v31 }
 0x4ba   :  { %v365_v33 = vmul.f32 1.442695, %v364_v32 }
 0x4bc   :  { %534 = vpow2.f32 %v365_v33 }
 0x4c6   :  { %v535_v34 = vpop.eup %534 }
 0x4c7   :  { %512 = vmatmul.mubr.msk.f32.vlgmr.msra.gmra.mrb[4].mxu0 %vm133_vm3, %v535_v34  ;;  %v367_v35 = vsel %vm123_vm2, %v535_v34, 0.0 }
 0x4c8   :  { %368 = vadd.xlane.f32.xlu1 %v367_v35 }
 0x555   :  { %v369_v36 = vpop.xlane.xlu1 %368 }
 0x556   :  { %536 = vrcp.f32 %v369_v36 }
 0x560   :  { %v537_v37 = vpop.eup %536 }
 0x59a   :  { %v439_v38 = vpop.f32.mrb[4].mxu0 }
 0x59b   :  { %v444_v39 = vmul.f32 %v537_v37, %v439_v38  ;;  %v513_v40 = vpop.f32.mrb[5].mxu0 }
 0x59d   :  { %446 = vst.msk [vmem:[#allocation7] sm:$0x1] %vm445_vm4, %v444_v39 }
 0x59e   :  { %593 = shalt.err (!%p590_p6)
}
 0x59f   :  { %s594_s21 = scalar_lea.hbm %s712_s4, 16 }
 0x5a0   :  { %p595_p7 = scmp.ne.s32.totalorder %s712_s4, %s594_s21  ;;  %p598_p8 = scmp.lt.u32.totalorder %s594_s21, %s712_s4 }
 0x5a2   :  { %p600_p9 = pnand %p598_p8, %p595_p7 }
 0x5a4   :  { %603 = shalt.err (!%p600_p9)
}
 0x5a5   :  { %456 = dma.vmem_to_hbm [thread:$0]  %s454_s16, 16, %s712_s4, [#allocation4]  }
 0x5a6   :  { %608 = dma.done.wait [#allocation4], 16  }
 0x5a7   :  { %609 = vsyncadd [#allocation4], 4294967280 }
 0x5a8   :  { %460 = vsyncpa [#allocation3], 1 }
 0x5a9   :  { %461 = vsyncpa [#allocation6], 1 }
 0x5aa   :  { %462 = vsyncpa [#allocation4], 1 }

</bundles_post_ra>
